<compile_context>
chip_gen: v5e
topology: v5e:2x2
jax: 0.10.0
libtpu: 0.0.40
codegen_flags: <defaults>
</compile_context>

<pallas_src>
import jax
import jax.numpy as jnp
from jax.experimental import pallas as pl
from jax.experimental.pallas import tpu as pltpu

LANE = 128  # TPU lane width; hidden feature dims are padded to this.


def _net_kernel(alpha_ref, x_ref, w1_ref, b1_ref, w2_ref, b2_ref, w3_ref, b3_ref, y_ref):
    # ---- linear1: (TB, V) @ (V, 128) + (1, 128) ; cols >= 50 are exactly 0 ----
    a1 = jnp.dot(x_ref[...], w1_ref[...], preferred_element_type=jnp.float32) + b1_ref[...]

    # ---- ReLU ----
    h1 = jnp.maximum(a1, 0.0)

    # ---- Dropout: eval/inference mode is the identity ----
    # TODO(synk): train-mode stochastic dropout (pltpu.prng_seed/prng_random_bits)
    # is not reproduced here.

    # ---- linear2: (TB, 128) @ (128, 128) + (1, 128) ; cols >= 100 are exactly 0 ----
    a2 = jnp.dot(h1.astype(w2_ref.dtype), w2_ref[...],
                 preferred_element_type=jnp.float32) + b2_ref[...]

    # ---- PReLU (single shared parameter, scalar from SMEM) ----
    alpha = alpha_ref[0, 0]
    h2 = jnp.where(a2 >= 0.0, a2, alpha * a2)

    # ---- out: (TB, 128) @ (128, 128) + (1, 128) ; only column 0 is real ----
    a3 = jnp.dot(h2.astype(w3_ref.dtype), w3_ref[...],
                 preferred_element_type=jnp.float32) + b3_ref[...]

    # ---- Sigmoid on the single real column; store a (TB, 1) tile ----
    y_ref[...] = jax.nn.sigmoid(a3[:, :1]).astype(y_ref.dtype)


def _round_up(n, m):
    return ((n + m - 1) // m) * m


def _choose_batch_tile(B, max_batch_tile):
    """Batch tile: multiple of 8 (sublane), as large as allowed, but capped so
    the grid keeps >= 2 steps when B allows it (so v7x's two TensorCores both
    get work under dimension_semantics=("parallel",)). v5e/v6e are single-TC
    and unaffected by the cap."""
    B8 = _round_up(max(B, 1), 8)
    tb = min(max_batch_tile, _round_up(pl.cdiv(B8, 2), 8))
    return max(tb, 8)


def net_forward(x, padded_params, *, max_batch_tile=2048):
    """x: (B, V) float. padded_params: output of pad_params(). Returns (B, 1) f32.

    The kernel is per-grid-step-overhead / HBM-read bound at small V, so the
    batch tile is made large (default cap 2048; 4096-8192 also fine at small V)
    while keeping >= 2 grid steps for v7x megacore sharding.  VMEM is not the
    constraint here: resident weights + double-buffered (TB, V) input tiles and
    (TB, 1) output tiles total only a few MiB.
    """
    p = padded_params
    B, V = x.shape
    x = x.astype(p["w1"].dtype)   # bf16 by default: halves activation HBM reads

    TB = _choose_batch_tile(B, max_batch_tile)
    padded_B = _round_up(B, TB)
    if padded_B != B:
        x = jnp.pad(x, ((0, padded_B - B), (0, 0)))
    grid = (padded_B // TB,)

    resident = lambda arr: pl.BlockSpec(arr.shape, lambda i: (0, 0))  # stays in VMEM

    out = pl.pallas_call(
        _net_kernel,
        out_shape=jax.ShapeDtypeStruct((padded_B, 1), jnp.float32),
        grid=grid,
        in_specs=[
            pl.BlockSpec(memory_space=pltpu.MemorySpace.SMEM),  # prelu alpha (scalar)
            pl.BlockSpec((TB, V), lambda i: (i, 0)),            # x: batch-tiled, pipelined
            resident(p["w1"]), resident(p["b1"]),
            resident(p["w2"]), resident(p["b2"]),
            resident(p["w3"]), resident(p["b3"]),
        ],
        out_specs=pl.BlockSpec((TB, 1), lambda i: (i, 0)),      # single real output column
        compiler_params=pltpu.CompilerParams(
            dimension_semantics=("parallel",)),                 # megacore on v7x
    )(p["prelu_a"], x, p["w1"], p["b1"], p["w2"], p["b2"], p["w3"], p["b3"])

    return out[:B]


def init_params(key, vocab_size):
    """Deterministic init matching the PyTorch module's parameter shapes.
    PyTorch stores Linear weight as (out, in); we keep the transposed (in, out)
    layout so the kernel computes x @ W directly."""
    k1, k2, k3, k4, k5, k6 = jax.random.split(key, 6)

    def linear(kw, kb, fan_in, fan_out):
        bound = 1.0 / jnp.sqrt(fan_in)
        w = jax.random.uniform(kw, (fan_in, fan_out), jnp.float32, -bound, bound)
        b = jax.random.uniform(kb, (1, fan_out), jnp.float32, -bound, bound)
        return w, b

    w1, b1 = linear(k1, k2, vocab_size, 50)
    w2, b2 = linear(k3, k4, 50, 100)
    w3, b3 = linear(k5, k6, 100, 1)
    prelu_a = jnp.full((1, 1), 0.25, jnp.float32)  # nn.PReLU(1) default init

    return {"w1": w1, "b1": b1, "w2": w2, "b2": b2,
            "prelu_a": prelu_a, "w3": w3, "b3": b3}


def pad_params(params, compute_dtype=jnp.bfloat16):
    """Zero-pad all feature dims to LANE (128) so every matmul is lane-dense.
    Padding is exact: padded hidden units are 0 through ReLU/PReLU and padded
    w3 rows/cols never touch real output column 0.  MXU operands (w1/w2/w3 and,
    via the wrapper, x) default to bf16; biases, PReLU alpha, accumulation and
    elementwise math stay f32.  Pass compute_dtype=jnp.float32 for bit-exact
    f32 matmul operands."""
    def pad2(a, rows, cols, dt):
        return jnp.pad(a, ((0, rows - a.shape[0]), (0, cols - a.shape[1]))).astype(dt)

    V = params["w1"].shape[0]
    return {
        "w1": pad2(params["w1"], V, LANE, compute_dtype),
        "b1": pad2(params["b1"], 1, LANE, jnp.float32),
        "w2": pad2(params["w2"], LANE, LANE, compute_dtype),
        "b2": pad2(params["b2"], 1, LANE, jnp.float32),
        "w3": pad2(params["w3"], LANE, LANE, compute_dtype),
        "b3": pad2(params["b3"], 1, LANE, jnp.float32),
        "prelu_a": params["prelu_a"].astype(jnp.float32),
    }


def _reference(x, p):
    a1 = x @ p["w1"] + p["b1"]
    h1 = jnp.maximum(a1, 0.0)
    a2 = h1 @ p["w2"] + p["b2"]
    h2 = jnp.where(a2 >= 0.0, a2, p["prelu_a"][0, 0] * a2)
    a3 = h2 @ p["w3"] + p["b3"]
    return jax.nn.sigmoid(a3)


if __name__ == "__main__":
    key = jax.random.PRNGKey(0)
    kx, kp, kx2 = jax.random.split(key, 3)

    batch, vocab_size = 8, 32
    x = jax.random.normal(kx, (batch, vocab_size), jnp.float32)
    raw_params = init_params(kp, vocab_size)
    y_expected = _reference(x, raw_params)

    # Default path: bf16 MXU operands (halves HBM/VMEM bytes) -> loose tolerance.
    params_bf16 = pad_params(raw_params)
    y = net_forward(x, params_bf16)
    jax.block_until_ready(y)
    assert y.shape == (batch, 1), y.shape
    assert jnp.allclose(y, y_expected, atol=2e-2, rtol=2e-2)

    # f32 operands: tight tolerance verifies the padding/fusion math is exact.
    params_f32 = pad_params(raw_params, compute_dtype=jnp.float32)
    y32 = net_forward(x, params_f32)
    jax.block_until_ready(y32)
    assert jnp.allclose(y32, y_expected, atol=1e-5, rtol=1e-5)

    # Ragged batch (not a multiple of the tile) exercises the pad/slice path
    # and a 2-step grid (the v7x megacore cap keeps >= 2 steps here).
    x2 = jax.random.normal(kx2, (13, vocab_size), jnp.float32)
    y2 = net_forward(x2, params_f32)
    jax.block_until_ready(y2)
    assert y2.shape == (13, 1), y2.shape
    assert jnp.allclose(y2, _reference(x2, raw_params), atol=1e-5, rtol=1e-5)

    print("KERNEL_OK")
</pallas_src>

<mosaic_0001>
module attributes {stable_mosaic.version = 11 : i64} {
  func.func @_net_kernel(%arg0: i32, %arg1: memref<1x1xf32, #tpu.memory_space<smem>>, %arg2: memref<8x32xbf16, #tpu.memory_space<vmem>>, %arg3: memref<32x128xbf16, #tpu.memory_space<vmem>>, %arg4: memref<1x128xf32, #tpu.memory_space<vmem>>, %arg5: memref<128x128xbf16, #tpu.memory_space<vmem>>, %arg6: memref<1x128xf32, #tpu.memory_space<vmem>>, %arg7: memref<128x128xbf16, #tpu.memory_space<vmem>>, %arg8: memref<1x128xf32, #tpu.memory_space<vmem>>, %arg9: memref<8x1xf32, #tpu.memory_space<vmem>>) attributes {dimension_semantics = [#tpu.dimension_semantics<parallel>], iteration_bounds = array<i64: 1>, scalar_prefetch = 0 : i64, scratch_operands = 0 : i64, tpu.core_type = #tpu.core_type<tc>, window_params = [{transform_indices = @transform_0, window_bounds = array<i64: 1, 1>}, {transform_indices = @transform_1, window_bounds = array<i64: 8, 32>}, {pipeline_mode = #tpu.pipeline_mode<synchronous>, transform_indices = @transform_2, window_bounds = array<i64: 32, 128>}, {pipeline_mode = #tpu.pipeline_mode<synchronous>, transform_indices = @transform_3, window_bounds = array<i64: 1, 128>}, {pipeline_mode = #tpu.pipeline_mode<synchronous>, transform_indices = @transform_4, window_bounds = array<i64: 128, 128>}, {pipeline_mode = #tpu.pipeline_mode<synchronous>, transform_indices = @transform_5, window_bounds = array<i64: 1, 128>}, {pipeline_mode = #tpu.pipeline_mode<synchronous>, transform_indices = @transform_6, window_bounds = array<i64: 128, 128>}, {pipeline_mode = #tpu.pipeline_mode<synchronous>, transform_indices = @transform_7, window_bounds = array<i64: 1, 128>}, {transform_indices = @transform_8, window_bounds = array<i64: 8, 1>}]} {
    %c0 = arith.constant 0 : index
    %c0_0 = arith.constant 0 : index
    %0 = vector.load %arg2[%c0, %c0_0] : memref<8x32xbf16, #tpu.memory_space<vmem>>, vector<8x32xbf16>
    %c0_1 = arith.constant 0 : index
    %c0_2 = arith.constant 0 : index
    %1 = vector.load %arg3[%c0_1, %c0_2] : memref<32x128xbf16, #tpu.memory_space<vmem>>, vector<32x128xbf16>
    %cst = arith.constant dense<0.000000e+00> : vector<8x128xf32>
    %2 = tpu.matmul %0, %1, %cst {dimension_numbers = #tpu.dot_dimension_numbers<[1], [0], [0], [1], [0, 0, 1, 1], [], []>} : vector<8x32xbf16>, vector<32x128xbf16>, vector<8x128xf32> -> vector<8x128xf32>
    %c0_3 = arith.constant 0 : index
    %c0_4 = arith.constant 0 : index
    %3 = vector.load %arg4[%c0_3, %c0_4] : memref<1x128xf32, #tpu.memory_space<vmem>>, vector<1x128xf32>
    %4 = vector.broadcast %3 : vector<1x128xf32> to vector<8x128xf32>
    %5 = arith.addf %2, %4 : vector<8x128xf32>
    %cst_5 = arith.constant 0.000000e+00 : f32
    %6 = vector.broadcast %cst_5 : f32 to vector<8x128xf32>
    %7 = arith.maximumf %5, %6 : vector<8x128xf32>
    %8 = arith.truncf %7 : vector<8x128xf32> to vector<8x128xbf16>
    %c0_6 = arith.constant 0 : index
    %c0_7 = arith.constant 0 : index
    %9 = vector.load %arg5[%c0_6, %c0_7] : memref<128x128xbf16, #tpu.memory_space<vmem>>, vector<128x128xbf16>
    %cst_8 = arith.constant dense<0.000000e+00> : vector<8x128xf32>
    %10 = tpu.matmul %8, %9, %cst_8 {dimension_numbers = #tpu.dot_dimension_numbers<[1], [0], [0], [1], [0, 0, 1, 1], [], []>} : vector<8x128xbf16>, vector<128x128xbf16>, vector<8x128xf32> -> vector<8x128xf32>
    %c0_9 = arith.constant 0 : index
    %c0_10 = arith.constant 0 : index
    %11 = vector.load %arg6[%c0_9, %c0_10] : memref<1x128xf32, #tpu.memory_space<vmem>>, vector<1x128xf32>
    %12 = vector.broadcast %11 : vector<1x128xf32> to vector<8x128xf32>
    %13 = arith.addf %10, %12 : vector<8x128xf32>
    %c0_11 = arith.constant 0 : index
    %c0_12 = arith.constant 0 : index
    %14 = memref.load %arg1[%c0_11, %c0_12] : memref<1x1xf32, #tpu.memory_space<smem>>
    %cst_13 = arith.constant 0.000000e+00 : f32
    %15 = vector.broadcast %cst_13 : f32 to vector<8x128xf32>
    %16 = arith.cmpf oge, %13, %15 : vector<8x128xf32>
    %17 = vector.broadcast %14 : f32 to vector<8x128xf32>
    %18 = arith.mulf %17, %13 : vector<8x128xf32>
    %19 = arith.select %16, %13, %18 : vector<8x128xi1>, vector<8x128xf32>
    %20 = arith.truncf %19 : vector<8x128xf32> to vector<8x128xbf16>
    %c0_14 = arith.constant 0 : index
    %c0_15 = arith.constant 0 : index
    %21 = vector.load %arg7[%c0_14, %c0_15] : memref<128x128xbf16, #tpu.memory_space<vmem>>, vector<128x128xbf16>
    %cst_16 = arith.constant dense<0.000000e+00> : vector<8x128xf32>
    %22 = tpu.matmul %20, %21, %cst_16 {dimension_numbers = #tpu.dot_dimension_numbers<[1], [0], [0], [1], [0, 0, 1, 1], [], []>} : vector<8x128xbf16>, vector<128x128xbf16>, vector<8x128xf32> -> vector<8x128xf32>
    %c0_17 = arith.constant 0 : index
    %c0_18 = arith.constant 0 : index
    %23 = vector.load %arg8[%c0_17, %c0_18] : memref<1x128xf32, #tpu.memory_space<vmem>>, vector<1x128xf32>
    %24 = vector.broadcast %23 : vector<1x128xf32> to vector<8x128xf32>
    %25 = arith.addf %22, %24 : vector<8x128xf32>
    %26 = vector.extract_strided_slice %25 {offsets = [0, 0], sizes = [8, 1], strides = [1, 1]} : vector<8x128xf32> to vector<8x1xf32>
    %27 = arith.negf %26 : vector<8x1xf32>
    %28 = math.exp %27 : vector<8x1xf32>
    %cst_19 = arith.constant 1.000000e+00 : f32
    %29 = vector.broadcast %cst_19 : f32 to vector<8x1xf32>
    %30 = arith.addf %29, %28 : vector<8x1xf32>
    %31 = arith.divf %29, %30 : vector<8x1xf32>
    %c0_20 = arith.constant 0 : index
    %c0_21 = arith.constant 0 : index
    %32 = vector.load %arg9[%c0_20, %c0_21] : memref<8x1xf32, #tpu.memory_space<vmem>>, vector<8x1xf32>
    tpu.vector_store %arg9[%c0_20, %c0_21], %31 {strides = array<i32>} : memref<8x1xf32, #tpu.memory_space<vmem>>, vector<8x1xf32>,
    return
  }
  func.func @transform_0(%arg0: i32) -> (i32, i32) {
    %c0_i32 = arith.constant 0 : i32
    %c0_i32_0 = arith.constant 0 : i32
    %c0_i32_1 = arith.constant 0 : i32
    return %c0_i32, %c0_i32_0 : i32, i32
  }
  func.func @transform_1(%arg0: i32) -> (i32, i32) {
    %c0_i32 = arith.constant 0 : i32
    %c0_i32_0 = arith.constant 0 : i32
    return %arg0, %c0_i32 : i32, i32
  }
  func.func @transform_2(%arg0: i32) -> (i32, i32) {
    %c0_i32 = arith.constant 0 : i32
    %c0_i32_0 = arith.constant 0 : i32
    %c0_i32_1 = arith.constant 0 : i32
    return %c0_i32, %c0_i32_0 : i32, i32
  }
  func.func @transform_3(%arg0: i32) -> (i32, i32) {
    %c0_i32 = arith.constant 0 : i32
    %c0_i32_0 = arith.constant 0 : i32
    %c0_i32_1 = arith.constant 0 : i32
    return %c0_i32, %c0_i32_0 : i32, i32
  }
  func.func @transform_4(%arg0: i32) -> (i32, i32) {
    %c0_i32 = arith.constant 0 : i32
    %c0_i32_0 = arith.constant 0 : i32
    %c0_i32_1 = arith.constant 0 : i32
    return %c0_i32, %c0_i32_0 : i32, i32
  }
  func.func @transform_5(%arg0: i32) -> (i32, i32) {
    %c0_i32 = arith.constant 0 : i32
    %c0_i32_0 = arith.constant 0 : i32
    %c0_i32_1 = arith.constant 0 : i32
    return %c0_i32, %c0_i32_0 : i32, i32
  }
  func.func @transform_6(%arg0: i32) -> (i32, i32) {
    %c0_i32 = arith.constant 0 : i32
    %c0_i32_0 = arith.constant 0 : i32
    %c0_i32_1 = arith.constant 0 : i32
    return %c0_i32, %c0_i32_0 : i32, i32
  }
  func.func @transform_7(%arg0: i32) -> (i32, i32) {
    %c0_i32 = arith.constant 0 : i32
    %c0_i32_0 = arith.constant 0 : i32
    %c0_i32_1 = arith.constant 0 : i32
    return %c0_i32, %c0_i32_0 : i32, i32
  }
  func.func @transform_8(%arg0: i32) -> (i32, i32) {
    %c0_i32 = arith.constant 0 : i32
    %c0_i32_0 = arith.constant 0 : i32
    return %arg0, %c0_i32 : i32, i32
  }
}

</mosaic_0001>

<bundles_post_ra>
// kernel: tpu_custom_call.1
= control target key start
LH: loop header
LB: loop body
LE: loop exit
PB: predicated region body
PF: predicated region fallthrough
CT: control target
= control target key end

     0   :  { %14 = vsyncpa [#allocation4], 0  ;;  %s613_s0 = inlined_call_operand.<no memory space> [shape: f32[1,1], index: 0, kind: input, shape index: {}]   ;;  %s614_s1 = inlined_call_operand.hbm [shape: bf16[8,32], index: 1, kind: input, shape index: {}]   ;;  %s615_s2 = inlined_call_operand.hbm [shape: bf16[32,128], index: 2, kind: input, shape index: {}]   ;;  %s616_s3 = inlined_call_operand.vmem [shape: f32[1,128], index: 3, kind: input, shape index: {}]   ;;  %s617_s4 = inlined_call_operand.hbm [shape: bf16[128,128], index: 4, kind: input, shape index: {}]   ;;  %s618_s5 = inlined_call_operand.vmem [shape: f32[1,128], index: 5, kind: input, shape index: {}]   ;;  %s619_s6 = inlined_call_operand.hbm [shape: bf16[128,128], index: 6, kind: input, shape index: {}]   ;;  %s620_s7 = inlined_call_operand.vmem [shape: f32[1,128], index: 7, kind: input, shape index: {}]   ;;  %s621_s8 = inlined_call_operand.vmem [shape: f32[8,1], index: 8, kind: output, shape index: {}]  }
   0x1   :  { %15 = vsyncpa [#allocation6], 0  ;;  %s34_s29 = sshll.u32 %s615_s2, 4  ;;  %s35_s29 = int_to_ptr.hbm [resolvable:$true] %s34_s29 }
   0x2   :  { %16 = vsyncpa [#allocation9], 0  ;;  %s535_s30 = smov [#allocation5]   ;;  %s24_s12 = sshll.u32 %s614_s1, 4  ;;  %s25_s12 = int_to_ptr.hbm [resolvable:$true] %s24_s12 }
   0x3   :  { %s36_s9 = sshll.u32 %s535_s30, 4  ;;  %s536_s13 = smov 64   ;;  %s37_s9 = int_to_ptr.vmem [resolvable:$true] %s36_s9 }
   0x4   :  { %s537_s14 = smov 4   ;;  %s538_s15 = smov [#allocation3]  }
   0x5   :  { %42 = dma.hbm_to_vmem [thread:$0]  %s35_s29, 256, %s37_s9, [#allocation6], %s536_s13, %s536_s13, %s537_s14  }
   0x6   :  { %s26_s16 = sshll.u32 %s538_s15, 4  ;;  %s49_s19 = sshll.u32 %s617_s4, 4  ;;  %s27_s16 = int_to_ptr.vmem [resolvable:$true] %s26_s16  ;;  %s50_s19 = int_to_ptr.hbm [resolvable:$true] %s49_s19 }
   0x7   :  { %29 = dma.hbm_to_vmem [thread:$0]  %s25_s12, 64, %s27_s16, [#allocation4]  }
   0x8   :  { %s64_s21 = sshll.u32 %s619_s6, 4  ;;  %s539_s22 = smov [#allocation7]   ;;  %s65_s21 = int_to_ptr.hbm [resolvable:$true] %s64_s21 }
   0x9   :  { %s51_s23 = sshll.u32 %s539_s22, 4  ;;  %s540_s1 = smov [#allocation8]   ;;  %s52_s23 = int_to_ptr.vmem [resolvable:$true] %s51_s23 }
   0xa   :  { %57 = dma.hbm_to_vmem [thread:$0]  %s50_s19, 1024, %s52_s23, [#allocation6], %s536_s13, %s536_s13, %s537_s14  }
   0xb   :  { %s66_s24 = sshll.u32 %s540_s1, 4  ;;  %s67_s24 = int_to_ptr.vmem [resolvable:$true] %s66_s24 }
   0xc   :  { %72 = dma.hbm_to_vmem [thread:$0]  %s65_s21, 1024, %s67_s24, [#allocation9], %s536_s13, %s536_s13, %s537_s14  }
   0xd   :  { %529 = dma.done.wait [#allocation4], 64  }
   0xe   :  { %530 = vsyncadd [#allocation4], 4294967232 }
   0xf   :  { %531 = dma.done.wait [#allocation6], 1280  }
  0x10   :  { %532 = vsyncadd [#allocation6], 4294966016 }
  0x11   :  { %533 = dma.done.wait [#allocation9], 1024  }
  0x12   :  { %534 = vsyncadd [#allocation9], 4294966272  ;;  %v403_v0 = vld [vmem:[#allocation5 + $0x8] sm:$0xff]  ;;  %v402_v2 = vld [vmem:[#allocation5] sm:$0xff]  ;;  %vm113_vm0 = vcmask 261120   ;;  %v215_v27 = vstv %s613_s0  ;;  %vm319_vm5 = vcmask 7168  }
  0x13   :  { %v411_v1 = vld [vmem:[#allocation7 + $0x38] sm:$0xff]  ;;  %123 = vmatpush.bf16.msra.mxu0 %v403_v0  ;;  %v410_v3 = vld [vmem:[#allocation7 + $0x30] sm:$0xff]  ;;  %v92_v4 = vld [vmem:[#allocation3] sm:$0xf] }
  0x14   :  { %200 = vmatpush.bf16.msra.mxu1 %v411_v1  ;;  %v409_v5 = vld [vmem:[#allocation7 + $0x28] sm:$0xff]  ;;  %v408_v6 = vld [vmem:[#allocation7 + $0x20] sm:$0xff]  ;;  %v407_v7 = vld [vmem:[#allocation7 + $0x18] sm:$0xff] }
  0x15   :  { %v406_v8 = vld [vmem:[#allocation7 + $0x10] sm:$0xff]  ;;  %v405_v9 = vld [vmem:[#allocation7 + $0x8] sm:$0xff]  ;;  %v404_v10 = vld [vmem:[#allocation7] sm:$0xff] }
  0x16   :  { %v419_v11 = vld [vmem:[#allocation8 + $0x38] sm:$0xff]  ;;  %v418_v12 = vld [vmem:[#allocation8 + $0x30] sm:$0xff]  ;;  %v417_v13 = vld [vmem:[#allocation8 + $0x28] sm:$0xff] }
  0x17   :  { %124 = vmatpush.bf16.msra.mxu0 %v402_v2  ;;  %287 = vmatpush.bf16.msra.mxu2 %v419_v11  ;;  %v416_v14 = vld [vmem:[#allocation8 + $0x20] sm:$0xff]  ;;  %v415_v15 = vld [vmem:[#allocation8 + $0x18] sm:$0xff]  ;;  %v414_v16 = vld [vmem:[#allocation8 + $0x10] sm:$0xff] }
  0x18   :  { %201 = vmatpush.bf16.msra.mxu1 %v410_v3  ;;  %v426_v17 = vld [vmem:[%s616_s3] ss:$0 sm:$0xff]  ;;  %v412_v24 = vld [vmem:[#allocation8] sm:$0xff] }
  0x19   :  { %v413_v23 = vld [vmem:[#allocation8 + $0x8] sm:$0xff] }
  0x1a   :  { %336 = vmatmul.msk.bf16.vlgmr.msra.gmra.mxu0 %vm113_vm0, %v92_v4  ;;  %v427_v25 = vld [vmem:[%s618_s5] ss:$0 sm:$0xff] }
  0x1b   :  { %288 = vmatpush.bf16.msra.mxu2 %v418_v12  ;;  %v428_v33 = vld [vmem:[%s620_s7] ss:$0 sm:$0xff] }
  0x1c   :  { %202 = vmatpush.bf16.msra.mxu1 %v409_v5 }
  0x1f   :  { %289 = vmatpush.bf16.msra.mxu2 %v417_v13 }
  0x20   :  { %203 = vmatpush.bf16.msra.mxu1 %v408_v6 }
  0x23   :  { %290 = vmatpush.bf16.msra.mxu2 %v416_v14 }
  0x24   :  { %204 = vmatpush.bf16.msra.mxu1 %v407_v7 }
  0x27   :  { %291 = vmatpush.bf16.msra.mxu2 %v415_v15 }
  0x28   :  { %205 = vmatpush.bf16.msra.mxu1 %v406_v8 }
  0x2b   :  { %292 = vmatpush.bf16.msra.mxu2 %v414_v16 }
  0x2c   :  { %206 = vmatpush.bf16.msra.mxu1 %v405_v9 }
  0x2f   :  { %293 = vmatpush.bf16.msra.mxu2 %v413_v23 }
  0x30   :  { %207 = vmatpush.bf16.msra.mxu1 %v404_v10 }
  0x33   :  { %294 = vmatpush.bf16.msra.mxu2 %v412_v24 }
  0x97   :  { %v126_v18 = vpop.f32.mrf.mxu0 }
  0x98   :  { %v127_v19 = vadd.f32 %v426_v17, %v126_v18 }
  0x9a   :  { %v130_v20 = vmax.f32 %v127_v19, 0.0 }
  0x9c   :  { %v131_v21 = vpack.c.bf16 %v130_v20, %v130_v20 }
  0x9e   :  { %208 = vmatmul.bf16.vlgmr.msra.gmra.mxu1 %v131_v21 }
  0x9f   :  { %v128_v22 = vpop.f32.mrf.mxu0 }
 0x11b   :  { %v209_v26 = vpop.f32.mrf.mxu1 }
 0x11c   :  { %v210_v28 = vadd.f32 %v427_v25, %v209_v26 }
 0x11e   :  { %v216_v29 = vmul.f32 %v215_v27, %v210_v28  ;;  %vm214_vm1 = vcmp.ge.f32.partialorder %v210_v28, 0.0 }
 0x120   :  { %v217_v30 = vsel %vm214_vm1, %v210_v28, %v216_v29 }
 0x121   :  { %v218_v31 = vpack.c.bf16 %v217_v30, %v217_v30 }
 0x123   :  { %v211_v32 = vpop.f32.mrf.mxu1  ;;  %295 = vmatmul.bf16.vlgmr.msra.gmra.mxu2 %v218_v31 }
 0x1a6   :  { %v296_v34 = vpop.f32.mrf.mxu2 }
 0x1a7   :  { %v297_v35 = vadd.f32 %v428_v33, %v296_v34 }
 0x1a9   :  { %v401_v36 = vmul.f32 -1.442695, %v297_v35 }
 0x1ab   :  { %429 = vpow2.f32 %v401_v36 }
 0x1ae   :  { %v298_v37 = vpop.f32.mrf.mxu2 }
 0x1b1   :  { %v430_v38 = vpop.eup %429 }
 0x1b2   :  { %v303_v39 = vadd.f32 1.0, %v430_v38 }
 0x1b4   :  { %431 = vrcp.f32 %v303_v39  ;;  %v315_v43 = vand.u32 2147483648, %v303_v39  ;;  %v313_v45 = vand.u32 2147483647, %v303_v39  ;;  %vm309_vm3 = vweird.f32 %v303_v39 }
 0x1b6   :  { %v316_v47 = vor.u32 1.1754944e-38, %v315_v43  ;;  %vm314_vm6 = vcmp.eq.f32.partialorder %v313_v45, 8.507059e+37 }
 0x1ba   :  { %v432_v40 = vpop.eup %431 }
 0x1bb   :  { %v305_v41 = vmul.f32 %v432_v40, %v303_v39  ;;  %vm310_vm2 = vweird.f32 %v432_v40 }
 0x1bc   :  { %vm311_vm4 = vmor %vm309_vm3, %vm310_vm2 }
 0x1bd   :  { %v306_v42 = vsub.f32 1.0, %v305_v41 }
 0x1bf   :  { %v307_v44 = vmul.f32 %v432_v40, %v306_v42 }
 0x1c1   :  { %v308_v46 = vadd.f32 %v432_v40, %v307_v44 }
 0x1c3   :  { %v312_v48 = vsel %vm311_vm4, %v432_v40, %v308_v46 }
 0x1c4   :  { %v317_v49 = vsel %vm314_vm6, %v316_v47, %v312_v48 }
 0x1c5   :  { %320 = vst.msk [vmem:[%s621_s8] sm:$0xff] %vm319_vm5, %v317_v49 }
 0x1c6   :  { %325 = vsyncpa [#allocation4], 1 }
 0x1c7   :  { %326 = vsyncpa [#allocation6], 1 }
 0x1c8   :  { %327 = vsyncpa [#allocation9], 1 }

</bundles_post_ra>
